<compile_context>
chip_gen: v7x
topology: tpu7x:2x2x1
jax: 0.10.0
libtpu: 0.0.40
codegen_flags: <defaults>
</compile_context>

<pallas_src>
import functools

import numpy as np
import jax
import jax.numpy as jnp
from jax import lax
from jax.experimental import pallas as pl
from jax.experimental.pallas import tpu as pltpu


def _dwconv_kernel(w_ref, b_ref, m_ref, x_ref, o_ref, *, H, W):
    # w_ref : VMEM (cb, 9)  f32 — per-plane depthwise taps, index t = ky*3 + kx
    # b_ref : VMEM (cb, 1)  f32 — per-plane bias
    # m_ref : VMEM (9, H*W) f32 — per-tap validity masks (shared by all planes)
    # x_ref : VMEM (cb, H*W)    — cb independent channel planes, flattened
    # o_ref : VMEM (cb, H*W)
    HW = H * W
    x = x_ref[...].astype(jnp.float32)          # (cb, HW) compute in f32
    w = w_ref[...]                              # (cb, 9)
    b = b_ref[...]                              # (cb, 1)

    # Center tap + bias folded into the accumulator init (center tap is always
    # in-bounds, so it needs no mask).
    acc = x * w[:, 4:5] + b                     # (cb, HW)

    # 8 neighbor taps: one XLU roll along lanes + border mask + per-plane FMA.
    # For tap (ky, kx): out[y, x] += w * in[y + ky - 1, x + kx - 1] (zero pad).
    for ky in range(3):
        for kx in range(3):
            t = ky * 3 + kx
            if t == 4:
                continue
            off = (ky - 1) * W + (kx - 1)       # flat-index offset of the tap
            shifted = pltpu.roll(x, (-off) % HW, 1)          # shifted[p] = x[p+off]
            acc = acc + (shifted * m_ref[t:t + 1, :]) * w[:, t:t + 1]

    o_ref[...] = acc.astype(o_ref.dtype)


def _tap_masks(H, W):
    """(9, H*W) f32 masks: 1 where the tap stays inside the image, else 0."""
    yy, xx = np.meshgrid(np.arange(H), np.arange(W), indexing="ij")
    yy = yy.reshape(-1)
    xx = xx.reshape(-1)
    masks = np.zeros((9, H * W), dtype=np.float32)
    for ky in range(3):
        for kx in range(3):
            dy, dx = ky - 1, kx - 1
            valid = ((yy + dy >= 0) & (yy + dy < H) &
                     (xx + dx >= 0) & (xx + dx < W))
            masks[ky * 3 + kx] = valid.astype(np.float32)
    return jnp.asarray(masks)


def _tpu_vmem_bytes():
    try:
        return int(pltpu.get_tpu_info().vmem_capacity_bytes)
    except Exception:
        return 64 * 1024 * 1024          # conservative default (v7x-sized)


def _num_tensorcores():
    try:
        kind = jax.devices()[0].device_kind.lower()
        return 2 if ("v7" in kind or "7x" in kind) else 1
    except Exception:
        return 1


def _pick_cb(nc, plane_bytes, target_bytes, num_cores):
    """Pick the channel-plane block size (rows of the (N*C, H*W) layout)."""
    budget = max(1, target_bytes // plane_bytes)
    # Sublane rule for a (cb, HW) block: cb must be a multiple of 8 or == NC.
    # Also require cb to divide NC exactly so the grid is clean.
    cands = [d for d in range(8, nc + 1, 8) if nc % d == 0 and d <= budget]
    if num_cores > 1 and cands:
        # Prefer an even step count so both TensorCores get equal work.
        balanced = [d for d in cands if (nc // d) % num_cores == 0]
        if balanced:
            cands = balanced
    if cands:
        return max(cands)
    return nc   # one full block (block dim == full array dim is always legal)


def dwconv(x_nchw, weight, bias):
    """Depthwise Conv2d(dim, dim, 3, stride=1, padding=1, groups=dim, bias=True).

    x_nchw: (N, C, H, W)   weight: (C, 1, 3, 3) (PyTorch layout)   bias: (C,)
    returns (N, C, H, W)
    """
    N, C, H, W = x_nchw.shape
    NC = N * C
    HW = H * W

    # Free reshape (no data movement): each row is one independent channel plane.
    x_r = x_nchw.reshape(NC, HW)
    # Tiny per-plane weight / bias tables (channel of row nc is nc % C).
    w_t = jnp.tile(weight.reshape(C, 9).astype(jnp.float32), (N, 1))   # (NC, 9)
    b_t = jnp.tile(bias.astype(jnp.float32), N).reshape(NC, 1)         # (NC, 1)
    masks = _tap_masks(H, W)                                           # (9, HW)

    vmem_cap = _tpu_vmem_bytes()
    num_cores = _num_tensorcores()
    # ~4 MiB of input per block on 128 MiB chips; scaled down on v7x (64 MiB)
    # to leave room for double-buffered in/out plus elementwise temporaries.
    target_block_bytes = min(4 << 20, vmem_cap // 24)
    plane_bytes = HW * x_nchw.dtype.itemsize
    cb = _pick_cb(NC, plane_bytes, target_block_bytes, num_cores)
    grid = (NC // cb,)

    vmem_limit = int(min(vmem_cap * 3 // 4, 96 * 1024 * 1024))

    out = pl.pallas_call(
        functools.partial(_dwconv_kernel, H=H, W=W),
        out_shape=jax.ShapeDtypeStruct((NC, HW), x_nchw.dtype),
        grid_spec=pltpu.PrefetchScalarGridSpec(
            num_scalar_prefetch=0,
            grid=grid,
            in_specs=[
                pl.BlockSpec((cb, 9), lambda i: (i, 0)),     # per-plane weights
                pl.BlockSpec((cb, 1), lambda i: (i, 0)),     # per-plane bias
                pl.BlockSpec((9, HW), lambda i: (0, 0)),     # tap masks (constant)
                pl.BlockSpec((cb, HW), lambda i: (i, 0)),    # activations
            ],
            out_specs=pl.BlockSpec((cb, HW), lambda i: (i, 0)),
        ),
        compiler_params=pltpu.CompilerParams(
            dimension_semantics=("parallel",),
            vmem_limit_bytes=vmem_limit,
        ),
    )(w_t, b_t, masks, x_r)

    return out.reshape(N, C, H, W)


def _reference(x_nchw, weight, bias):
    # Pure-JAX reference: grouped conv with feature_group_count = C.
    C = x_nchw.shape[1]
    y = lax.conv_general_dilated(
        x_nchw, weight,
        window_strides=(1, 1),
        padding=((1, 1), (1, 1)),
        dimension_numbers=("NCHW", "OIHW", "NCHW"),
        feature_group_count=C)
    return y + bias.reshape(1, C, 1, 1)


if __name__ == "__main__":
    key = jax.random.PRNGKey(0)
    kx_, kw_, kb_ = jax.random.split(key, 3)

    N, C, H, W = 2, 4, 16, 16      # small synthetic shapes
    x = jax.random.normal(kx_, (N, C, H, W), dtype=jnp.float32)
    # Conv2d(dim, dim, 3, groups=dim, bias=True): weight (dim,1,3,3), bias (dim,)
    weight = jax.random.normal(kw_, (C, 1, 3, 3), dtype=jnp.float32) * 0.1
    bias = jax.random.normal(kb_, (C,), dtype=jnp.float32) * 0.1

    y = dwconv(x, weight, bias)
    y = jax.block_until_ready(y)

    y_ref = _reference(x, weight, bias)
    assert y.shape == (N, C, H, W)
    assert jnp.allclose(y, y_ref, atol=1e-5, rtol=1e-5)
    print("KERNEL_OK")
</pallas_src>

<mosaic_0001>
module attributes {stable_mosaic.version = 11 : i64} {
  func.func @_dwconv_kernel(%arg0: i32, %arg1: memref<8x9xf32, #tpu.memory_space<vmem>>, %arg2: memref<8x1xf32, #tpu.memory_space<vmem>>, %arg3: memref<9x256xf32, #tpu.memory_space<vmem>>, %arg4: memref<8x256xf32, #tpu.memory_space<vmem>>, %arg5: memref<8x256xf32, #tpu.memory_space<vmem>>) attributes {dimension_semantics = [#tpu.dimension_semantics<parallel>], iteration_bounds = array<i64: 1>, scalar_prefetch = 0 : i64, scratch_operands = 0 : i64, tpu.core_type = #tpu.core_type<tc>, window_params = [{transform_indices = @transform_0, window_bounds = array<i64: 8, 9>}, {transform_indices = @transform_1, window_bounds = array<i64: 8, 1>}, {pipeline_mode = #tpu.pipeline_mode<synchronous>, transform_indices = @transform_2, window_bounds = array<i64: 9, 256>}, {transform_indices = @transform_3, window_bounds = array<i64: 8, 256>}, {transform_indices = @transform_4, window_bounds = array<i64: 8, 256>}]} {
    %c0 = arith.constant 0 : index
    %c0_0 = arith.constant 0 : index
    %0 = vector.load %arg4[%c0, %c0_0] : memref<8x256xf32, #tpu.memory_space<vmem>>, vector<8x256xf32>
    %c0_1 = arith.constant 0 : index
    %c0_2 = arith.constant 0 : index
    %1 = vector.load %arg1[%c0_1, %c0_2] : memref<8x9xf32, #tpu.memory_space<vmem>>, vector<8x9xf32>
    %c0_3 = arith.constant 0 : index
    %c0_4 = arith.constant 0 : index
    %2 = vector.load %arg2[%c0_3, %c0_4] : memref<8x1xf32, #tpu.memory_space<vmem>>, vector<8x1xf32>
    %3 = vector.extract_strided_slice %1 {offsets = [0, 4], sizes = [8, 1], strides = [1, 1]} : vector<8x9xf32> to vector<8x1xf32>
    %4 = vector.broadcast %3 : vector<8x1xf32> to vector<8x256xf32>
    %5 = arith.mulf %0, %4 : vector<8x256xf32>
    %6 = vector.broadcast %2 : vector<8x1xf32> to vector<8x256xf32>
    %7 = arith.addf %5, %6 : vector<8x256xf32>
    %c17_i32 = arith.constant 17 : i32
    %8 = tpu.dynamic_rotate %0 by %c17_i32 dim 1 : vector<8x256xf32>, i32 -> vector<8x256xf32>
    %c0_5 = arith.constant 0 : index
    %c0_6 = arith.constant 0 : index
    %9 = vector.load %arg3[%c0_5, %c0_6] : memref<9x256xf32, #tpu.memory_space<vmem>>, vector<1x256xf32>
    %10 = vector.broadcast %9 : vector<1x256xf32> to vector<8x256xf32>
    %11 = arith.mulf %8, %10 : vector<8x256xf32>
    %12 = vector.extract_strided_slice %1 {offsets = [0, 0], sizes = [8, 1], strides = [1, 1]} : vector<8x9xf32> to vector<8x1xf32>
    %13 = vector.broadcast %12 : vector<8x1xf32> to vector<8x256xf32>
    %14 = arith.mulf %11, %13 : vector<8x256xf32>
    %15 = arith.addf %7, %14 : vector<8x256xf32>
    %c16_i32 = arith.constant 16 : i32
    %16 = tpu.dynamic_rotate %0 by %c16_i32 dim 1 : vector<8x256xf32>, i32 -> vector<8x256xf32>
    %c1 = arith.constant 1 : index
    %c0_7 = arith.constant 0 : index
    %17 = vector.load %arg3[%c1, %c0_7] : memref<9x256xf32, #tpu.memory_space<vmem>>, vector<1x256xf32>
    %18 = vector.broadcast %17 : vector<1x256xf32> to vector<8x256xf32>
    %19 = arith.mulf %16, %18 : vector<8x256xf32>
    %20 = vector.extract_strided_slice %1 {offsets = [0, 1], sizes = [8, 1], strides = [1, 1]} : vector<8x9xf32> to vector<8x1xf32>
    %21 = vector.broadcast %20 : vector<8x1xf32> to vector<8x256xf32>
    %22 = arith.mulf %19, %21 : vector<8x256xf32>
    %23 = arith.addf %15, %22 : vector<8x256xf32>
    %c15_i32 = arith.constant 15 : i32
    %24 = tpu.dynamic_rotate %0 by %c15_i32 dim 1 : vector<8x256xf32>, i32 -> vector<8x256xf32>
    %c2 = arith.constant 2 : index
    %c0_8 = arith.constant 0 : index
    %25 = vector.load %arg3[%c2, %c0_8] : memref<9x256xf32, #tpu.memory_space<vmem>>, vector<1x256xf32>
    %26 = vector.broadcast %25 : vector<1x256xf32> to vector<8x256xf32>
    %27 = arith.mulf %24, %26 : vector<8x256xf32>
    %28 = vector.extract_strided_slice %1 {offsets = [0, 2], sizes = [8, 1], strides = [1, 1]} : vector<8x9xf32> to vector<8x1xf32>
    %29 = vector.broadcast %28 : vector<8x1xf32> to vector<8x256xf32>
    %30 = arith.mulf %27, %29 : vector<8x256xf32>
    %31 = arith.addf %23, %30 : vector<8x256xf32>
    %c1_i32 = arith.constant 1 : i32
    %32 = tpu.dynamic_rotate %0 by %c1_i32 dim 1 : vector<8x256xf32>, i32 -> vector<8x256xf32>
    %c3 = arith.constant 3 : index
    %c0_9 = arith.constant 0 : index
    %33 = vector.load %arg3[%c3, %c0_9] : memref<9x256xf32, #tpu.memory_space<vmem>>, vector<1x256xf32>
    %34 = vector.broadcast %33 : vector<1x256xf32> to vector<8x256xf32>
    %35 = arith.mulf %32, %34 : vector<8x256xf32>
    %36 = vector.extract_strided_slice %1 {offsets = [0, 3], sizes = [8, 1], strides = [1, 1]} : vector<8x9xf32> to vector<8x1xf32>
    %37 = vector.broadcast %36 : vector<8x1xf32> to vector<8x256xf32>
    %38 = arith.mulf %35, %37 : vector<8x256xf32>
    %39 = arith.addf %31, %38 : vector<8x256xf32>
    %c255_i32 = arith.constant 255 : i32
    %40 = tpu.dynamic_rotate %0 by %c255_i32 dim 1 : vector<8x256xf32>, i32 -> vector<8x256xf32>
    %c5 = arith.constant 5 : index
    %c0_10 = arith.constant 0 : index
    %41 = vector.load %arg3[%c5, %c0_10] : memref<9x256xf32, #tpu.memory_space<vmem>>, vector<1x256xf32>
    %42 = vector.broadcast %41 : vector<1x256xf32> to vector<8x256xf32>
    %43 = arith.mulf %40, %42 : vector<8x256xf32>
    %44 = vector.extract_strided_slice %1 {offsets = [0, 5], sizes = [8, 1], strides = [1, 1]} : vector<8x9xf32> to vector<8x1xf32>
    %45 = vector.broadcast %44 : vector<8x1xf32> to vector<8x256xf32>
    %46 = arith.mulf %43, %45 : vector<8x256xf32>
    %47 = arith.addf %39, %46 : vector<8x256xf32>
    %c241_i32 = arith.constant 241 : i32
    %48 = tpu.dynamic_rotate %0 by %c241_i32 dim 1 : vector<8x256xf32>, i32 -> vector<8x256xf32>
    %c6 = arith.constant 6 : index
    %c0_11 = arith.constant 0 : index
    %49 = vector.load %arg3[%c6, %c0_11] : memref<9x256xf32, #tpu.memory_space<vmem>>, vector<1x256xf32>
    %50 = vector.broadcast %49 : vector<1x256xf32> to vector<8x256xf32>
    %51 = arith.mulf %48, %50 : vector<8x256xf32>
    %52 = vector.extract_strided_slice %1 {offsets = [0, 6], sizes = [8, 1], strides = [1, 1]} : vector<8x9xf32> to vector<8x1xf32>
    %53 = vector.broadcast %52 : vector<8x1xf32> to vector<8x256xf32>
    %54 = arith.mulf %51, %53 : vector<8x256xf32>
    %55 = arith.addf %47, %54 : vector<8x256xf32>
    %c240_i32 = arith.constant 240 : i32
    %56 = tpu.dynamic_rotate %0 by %c240_i32 dim 1 : vector<8x256xf32>, i32 -> vector<8x256xf32>
    %c7 = arith.constant 7 : index
    %c0_12 = arith.constant 0 : index
    %57 = vector.load %arg3[%c7, %c0_12] : memref<9x256xf32, #tpu.memory_space<vmem>>, vector<1x256xf32>
    %58 = vector.broadcast %57 : vector<1x256xf32> to vector<8x256xf32>
    %59 = arith.mulf %56, %58 : vector<8x256xf32>
    %60 = vector.extract_strided_slice %1 {offsets = [0, 7], sizes = [8, 1], strides = [1, 1]} : vector<8x9xf32> to vector<8x1xf32>
    %61 = vector.broadcast %60 : vector<8x1xf32> to vector<8x256xf32>
    %62 = arith.mulf %59, %61 : vector<8x256xf32>
    %63 = arith.addf %55, %62 : vector<8x256xf32>
    %c239_i32 = arith.constant 239 : i32
    %64 = tpu.dynamic_rotate %0 by %c239_i32 dim 1 : vector<8x256xf32>, i32 -> vector<8x256xf32>
    %c8 = arith.constant 8 : index
    %c0_13 = arith.constant 0 : index
    %65 = vector.load %arg3[%c8, %c0_13] : memref<9x256xf32, #tpu.memory_space<vmem>>, vector<1x256xf32>
    %66 = vector.broadcast %65 : vector<1x256xf32> to vector<8x256xf32>
    %67 = arith.mulf %64, %66 : vector<8x256xf32>
    %68 = vector.extract_strided_slice %1 {offsets = [0, 8], sizes = [8, 1], strides = [1, 1]} : vector<8x9xf32> to vector<8x1xf32>
    %69 = vector.broadcast %68 : vector<8x1xf32> to vector<8x256xf32>
    %70 = arith.mulf %67, %69 : vector<8x256xf32>
    %71 = arith.addf %63, %70 : vector<8x256xf32>
    %c0_14 = arith.constant 0 : index
    %c0_15 = arith.constant 0 : index
    %72 = vector.load %arg5[%c0_14, %c0_15] : memref<8x256xf32, #tpu.memory_space<vmem>>, vector<8x256xf32>
    tpu.vector_store %arg5[%c0_14, %c0_15], %71 {strides = array<i32>} : memref<8x256xf32, #tpu.memory_space<vmem>>, vector<8x256xf32>,
    return
  }
  func.func @transform_0(%arg0: i32) -> (i32, i32) {
    %c0_i32 = arith.constant 0 : i32
    %c0_i32_0 = arith.constant 0 : i32
    return %arg0, %c0_i32 : i32, i32
  }
  func.func @transform_1(%arg0: i32) -> (i32, i32) {
    %c0_i32 = arith.constant 0 : i32
    %c0_i32_0 = arith.constant 0 : i32
    return %arg0, %c0_i32 : i32, i32
  }
  func.func @transform_2(%arg0: i32) -> (i32, i32) {
    %c0_i32 = arith.constant 0 : i32
    %c0_i32_0 = arith.constant 0 : i32
    %c0_i32_1 = arith.constant 0 : i32
    return %c0_i32, %c0_i32_0 : i32, i32
  }
  func.func @transform_3(%arg0: i32) -> (i32, i32) {
    %c0_i32 = arith.constant 0 : i32
    %c0_i32_0 = arith.constant 0 : i32
    return %arg0, %c0_i32 : i32, i32
  }
  func.func @transform_4(%arg0: i32) -> (i32, i32) {
    %c0_i32 = arith.constant 0 : i32
    %c0_i32_0 = arith.constant 0 : i32
    return %arg0, %c0_i32 : i32, i32
  }
}

</mosaic_0001>

<bundles_post_ra>
// kernel: tpu_custom_call.1
= control target key start
LH: loop header
LB: loop body
LE: loop exit
PB: predicated region body
PF: predicated region fallthrough
CT: control target
= control target key end

     0   :  { %9 = vsyncpa [#allocation3], 0  ;;  %s610_s0 = inlined_call_operand.hbm [shape: f32[8,9], index: 0, kind: input, shape index: {}]   ;;  %s611_s1 = inlined_call_operand.vmem [shape: f32[8,1], index: 1, kind: input, shape index: {}]   ;;  %s612_s2 = inlined_call_operand.hbm [shape: f32[9,256], index: 2, kind: input, shape index: {}]   ;;  %s613_s3 = inlined_call_operand.vmem [shape: f32[8,256], index: 3, kind: input, shape index: {}]   ;;  %s614_s4 = inlined_call_operand.hbm [shape: f32[8,256], index: 4, kind: output, shape index: {}]  }
   0x1   :  { %10 = vsyncpa [#allocation6], 0 }
   0x2   :  { %11 = vsyncpa [#allocation4], 0  ;;  %s424_s15 = smov [#allocation2]   ;;  %s425_s17 = smov [#allocation5]  }
   0x3   :  { %s18_s16 = sshll.u32 %s424_s15, 4  ;;  %s29_s18 = sshll.u32 %s425_s17, 4  ;;  %s19_s16 = int_to_ptr.vmem [resolvable:$true] %s18_s16  ;;  %s470_s18 = int_to_ptr.vmem [resolvable:$true] %s29_s18 }
   0x4   :  { %s352_s21 = scalar_lea.hbm %s610_s0, 128 }
   0x5   :  { %p353_p0 = scmp.ne.s32.totalorder %s610_s0, %s352_s21  ;;  %p356_p1 = scmp.lt.u32.totalorder %s352_s21, %s610_s0 }
   0x7   :  { %p358_p2 = pnand %p356_p1, %p353_p0 }
   0x9   :  { %361 = shalt.err (!%p358_p2)
}
   0xa   :  { %s362_s26 = scalar_lea.vmem %s19_s16, 128  ;;  %p367_p4 = scmp.lt.s32.totalorder %s19_s16, %s19_s16 }
   0xb   :  { %p363_p3 = scmp.ne.s32.totalorder %s19_s16, %s362_s26  ;;  %p368_p5 = scmp.lt.s32.totalorder %s362_s26, %s362_s26 }
   0xd   :  { %p369_p6 = por %p368_p5, %p367_p4 }
   0xf   :  { %p370_p7 = pnand %p369_p6, %p363_p3 }
  0x11   :  { %373 = shalt.err (!%p370_p7)
}
  0x12   :  { %21 = dma.hbm_to_vmem [thread:$0]  %s610_s0, 128, %s19_s16, [#allocation3]  }
  0x13   :  { %s374_s5 = scalar_lea.hbm %s612_s2, 512 }
  0x14   :  { %p375_p8 = scmp.ne.s32.totalorder %s612_s2, %s374_s5  ;;  %p378_p9 = scmp.lt.u32.totalorder %s374_s5, %s612_s2 }
  0x16   :  { %p380_p10 = pnand %p378_p9, %p375_p8 }
  0x18   :  { %383 = shalt.err (!%p380_p10)
}
  0x19   :  { %s384_s10 = scalar_lea.vmem %s470_s18, 512  ;;  %p389_p12 = scmp.lt.s32.totalorder %s470_s18, %s470_s18 }
  0x1a   :  { %p385_p11 = scmp.ne.s32.totalorder %s470_s18, %s384_s10  ;;  %p390_p13 = scmp.lt.s32.totalorder %s384_s10, %s384_s10 }
  0x1c   :  { %p391_p0 = por %p390_p13, %p389_p12 }
  0x1e   :  { %p392_p1 = pnand %p391_p0, %p385_p11 }
  0x20   :  { %395 = shalt.err (!%p392_p1)
}
  0x21   :  { %s426_s0 = smov 256   ;;  %s427_s11 = smov 16  }
  0x22   :  { %35 = dma.hbm_to_vmem [thread:$0]  %s612_s2, 512, %s470_s18, [#allocation6], %s426_s0, %s426_s0, %s427_s11  }
  0x23   :  { %418 = dma.done.wait [#allocation3], 128  }
  0x24   :  { %419 = vsyncadd [#allocation3], 4294967168 }
  0x25   :  { %420 = dma.done.wait [#allocation6], 512  }
  0x26   :  { %421 = vsyncadd [#allocation6], 4294966784  ;;  %v428_v0 = vmov 0   ;;  %v429_v1 = vmov 4   ;;  %v46_v2 = vld [vmem:[#allocation2] sm:$0xff]  ;;  %v430_v4 = vmov 1   ;;  %v66_v23 = vlaneseq }
  0x27   :  { %344 = vset.pattern.permute.xlu1 %v428_v0  ;;  %342 = vset.pattern.permute.xlu0 %v429_v1  ;;  %v47_v3 = vld [vmem:[%s611_s1] sm:$0xff]  ;;  %v512_v6 = vld [vmem:[%s613_s3 + $0x8] sm:$0xff]  ;;  %s431_s19 = smov 17   ;;  %v432_v7 = vmov 2   ;;  %v433_v8 = vmov 3   ;;  %s434_s1 = smov 15  }
  0x28   :  { %86 = vperm.xlu1 %344, %v46_v2   ;;  %50 = vperm.xlu0 %342, %v46_v2   ;;  %v507_v5 = vld [vmem:[%s613_s3] sm:$0xff]  ;;  %v435_v9 = vmov 5   ;;  %v436_v10 = vmov 6   ;;  %s437_s3 = smov 1   ;;  %v438_v11 = vmov 7   ;;  %v439_v12 = vmov 8  }
  0x29   :  { %s440_s20 = smov 127   ;;  %s441_s21 = smov 111   ;;  %v74_v26 = vshrl.u32 %v66_v23, 7  ;;  %v536_v28 = vand.u32 127, %v66_v23 }
  0x2a   :  { %s442_s22 = smov 113   ;;  %s443_s23 = smov 112   ;;  %v71_v33 = vld [vmem:[#allocation5] ss:$8 sm:$0x3] }
  0x2b   :  { %v538_v30 = vsub.s32 0, %v74_v26  ;;  %v540_v31 = vsub.s32 1, %v74_v26  ;;  %vm68_vm0 = vcmp.lt.s32.totalorder %v536_v28, 17  ;;  %v101_v35 = vld [vmem:[#allocation5 + $0x1] ss:$8 sm:$0x3] }
  0x2c   :  { %345 = vset.pattern.permute.xlu1 %v430_v4  ;;  %343 = vset.pattern.permute.xlu0 %v428_v0  ;;  %vm97_vm1 = vcmp.lt.s32.totalorder %v536_v28, 16  ;;  %vm127_vm2 = vcmp.lt.s32.totalorder %v536_v28, 15  ;;  %v131_v42 = vld [vmem:[#allocation5 + $0x2] ss:$8 sm:$0x3]  ;;  %vm157_vm3 = vcmp.lt.s32.totalorder %v536_v28, 1 }
  0x2d   :  { %116 = vperm.xlu1 %345, %v46_v2   ;;  %57 = vperm.xlu0 %343, %v47_v3   ;;  %v76_v36 = vrot.slane %v71_v33, %v538_v30  ;;  %v80_v37 = vrot.slane %v71_v33, %v540_v31  ;;  %v106_v40 = vrot.slane %v101_v35, %v538_v30  ;;  %v161_v43 = vld [vmem:[#allocation5 + $0x3] ss:$8 sm:$0x3]  ;;  %v191_v59 = vld [vmem:[#allocation5 + $0x5] ss:$8 sm:$0x3] }
  0x2e   :  { %v110_v41 = vrot.slane %v101_v35, %v540_v31  ;;  %v136_v52 = vrot.slane %v131_v42, %v538_v30  ;;  %v140_v53 = vrot.slane %v131_v42, %v540_v31  ;;  %v166_v54 = vrot.slane %v161_v43, %v538_v30  ;;  %v251_v26 = vld [vmem:[#allocation5 + $0x7] ss:$8 sm:$0x3]  ;;  %s444_s24 = smov [#allocation7]  }
  0x2f   :  { %v170_v63 = vrot.slane %v161_v43, %v540_v31  ;;  %vm187_vm4 = vcmp.lt.s32.totalorder %v536_v28, 127  ;;  %vm217_vm5 = vcmp.lt.s32.totalorder %v536_v28, 113  ;;  %vm247_vm6 = vcmp.lt.s32.totalorder %v536_v28, 112  ;;  %s311_s25 = sshll.u32 %s444_s24, 4  ;;  %s312_s25 = int_to_ptr.vmem [resolvable:$true] %s311_s25 }
  0x30   :  { %v260_v43 = vrot.slane %v251_v26, %v540_v31  ;;  %vm277_vm7 = vcmp.lt.s32.totalorder %v536_v28, 111  ;;  %s396_s26 = scalar_lea.vmem %s312_s25, 256  ;;  %p401_p3 = scmp.lt.s32.totalorder %s312_s25, %s312_s25 }
  0x31   :  { %62 = vrot.lane.b32.xlu1 %v507_v5, %s431_s19  ;;  %64 = vrot.lane.b32.xlu0 %v512_v6, %s431_s19  ;;  %p397_p2 = scmp.ne.s32.totalorder %s312_s25, %s396_s26  ;;  %p402_p4 = scmp.lt.s32.totalorder %s396_s26, %s396_s26 }
  0x32   :  { %346 = vset.pattern.permute.xlu1 %v432_v7  ;;  %347 = vset.pattern.permute.xlu0 %v433_v8  ;;  %v196_v7 = vrot.slane %v191_v59, %v538_v30  ;;  %v221_v8 = vld [vmem:[#allocation5 + $0x6] ss:$8 sm:$0x3] }
  0x33   :  { %p403_p5 = por %p402_p4, %p401_p3 }
  0x35   :  { %146 = vperm.xlu1 %346, %v46_v2   ;;  %93 = vrot.lane.b32.xlu0 %v507_v5, %s427_s11  ;;  %p404_p6 = pnand %p403_p5, %p397_p2 }
  0x39   :  { %95 = vrot.lane.b32.xlu1 %v512_v6, %s427_s11  ;;  %176 = vperm.xlu0 %347, %v46_v2  }
  0x3d   :  { %123 = vrot.lane.b32.xlu1 %v507_v5, %s434_s1  ;;  %348 = vset.pattern.permute.xlu0 %v435_v9 }
  0x3e   :  { %206 = vperm.xlu0 %348, %v46_v2  }
  0x41   :  { %125 = vrot.lane.b32.xlu1 %v512_v6, %s434_s1 }
  0x42   :  { %349 = vset.pattern.permute.xlu0 %v436_v10 }
  0x43   :  { %236 = vperm.xlu0 %349, %v46_v2  }
  0x45   :  { %153 = vrot.lane.b32.xlu1 %v507_v5, %s437_s3 }
  0x47   :  { %350 = vset.pattern.permute.xlu0 %v438_v11  ;;  %v200_v11 = vrot.slane %v191_v59, %v540_v31 }
  0x48   :  { %266 = vperm.xlu0 %350, %v46_v2  }
  0x49   :  { %155 = vrot.lane.b32.xlu1 %v512_v6, %s437_s3 }
  0x4c   :  { %351 = vset.pattern.permute.xlu0 %v439_v12 }
  0x4d   :  { %183 = vrot.lane.b32.xlu1 %v507_v5, %s440_s20  ;;  %296 = vperm.xlu0 %351, %v46_v2  }
  0x51   :  { %185 = vrot.lane.b32.xlu1 %v512_v6, %s440_s20  ;;  %273 = vrot.lane.b32.xlu0 %v507_v5, %s441_s21 }
  0x55   :  { %213 = vrot.lane.b32.xlu1 %v507_v5, %s442_s22 }
  0x59   :  { %215 = vrot.lane.b32.xlu1 %v512_v6, %s442_s22 }
  0x5d   :  { %243 = vrot.lane.b32.xlu1 %v507_v5, %s443_s23 }
  0x61   :  { %245 = vrot.lane.b32.xlu1 %v512_v6, %s443_s23 }
  0x65   :  { %275 = vrot.lane.b32.xlu1 %v512_v6, %s441_s21 }
  0xa7   :  { %v87_v13 = vpop.permute.xlu1 %86  ;;  %v51_v16 = vpop.permute.xlu0 %50 }
  0xa8   :  { %v53_v46 = vmul.f32 %v51_v16, %v507_v5  ;;  %v54_v47 = vmul.f32 %v51_v16, %v512_v6 }
  0xac   :  { %v530_v14 = vpop.permute.xlu1 %116  ;;  %v58_v18 = vpop.permute.xlu0 %57 }
  0xad   :  { %v60_v61 = vadd.f32 %v58_v18, %v53_v46  ;;  %v61_v62 = vadd.f32 %v58_v18, %v54_v47 }
  0xb0   :  { %v63_v15 = vpop.permute.xlu1 %62  ;;  %v65_v21 = vpop.permute.xlu0 %64 }
  0xb1   :  { %v69_v38 = vsel %vm68_vm0, %v63_v15, %v65_v21  ;;  %v70_v39 = vsel %vm68_vm0, %v65_v21, %v63_v15  ;;  %v226_v21 = vrot.slane %v221_v8, %v538_v30 }
  0xb2   :  { %v83_v50 = vmul.f32 %v76_v36, %v70_v39  ;;  %v84_v51 = vmul.f32 %v80_v37, %v69_v38 }
  0xb4   :  { %v532_v17 = vpop.permute.xlu1 %146  ;;  %v94_v24 = vpop.permute.xlu0 %93  ;;  %v89_v0 = vmul.f32 %v87_v13, %v83_v50  ;;  %v90_v1 = vmul.f32 %v87_v13, %v84_v51 }
  0xb8   :  { %v96_v19 = vpop.permute.xlu1 %95  ;;  %v534_v27 = vpop.permute.xlu0 %176 }
  0xb9   :  { %v98_v48 = vsel %vm97_vm1, %v94_v24, %v96_v19  ;;  %v99_v49 = vsel %vm97_vm1, %v96_v19, %v94_v24  ;;  %v91_v19 = vadd.f32 %v89_v0, %v60_v61 }
  0xba   :  { %v113_v55 = vmul.f32 %v106_v40, %v99_v49  ;;  %v114_v56 = vmul.f32 %v110_v41, %v98_v48  ;;  %v281_v40 = vld [vmem:[#allocation5 + $0x10] ss:$8 sm:$0x3] }
  0xbb   :  { %v286_v50 = vrot.slane %v281_v40, %v538_v30 }
  0xbc   :  { %v124_v20 = vpop.permute.xlu1 %123  ;;  %v119_v9 = vmul.f32 %v530_v14, %v113_v55  ;;  %v120_v10 = vmul.f32 %v530_v14, %v114_v56 }
  0xbd   :  { %v542_v32 = vpop.permute.xlu0 %206 }
  0xc0   :  { %v126_v22 = vpop.permute.xlu1 %125 }
  0xc1   :  { %v128_v57 = vsel %vm127_vm2, %v124_v20, %v126_v22  ;;  %v129_v58 = vsel %vm127_vm2, %v126_v22, %v124_v20  ;;  %v92_v20 = vadd.f32 %v90_v1, %v61_v62  ;;  %v230_v22 = vrot.slane %v221_v8, %v540_v31 }
  0xc2   :  { %v551_v45 = vpop.permute.xlu0 %236  ;;  %v143_v5 = vmul.f32 %v136_v52, %v129_v58  ;;  %v144_v6 = vmul.f32 %v140_v53, %v128_v57 }
  0xc3   :  { %v122_v37 = vadd.f32 %v120_v10, %v92_v20 }
  0xc4   :  { %v154_v25 = vpop.permute.xlu1 %153  ;;  %v149_v14 = vmul.f32 %v532_v17, %v143_v5  ;;  %v150_v23 = vmul.f32 %v532_v17, %v144_v6  ;;  %v256_v17 = vrot.slane %v251_v26, %v538_v30 }
  0xc6   :  { %v152_v46 = vadd.f32 %v150_v23, %v122_v37 }
  0xc7   :  { %v267_v4 = vpop.permute.xlu0 %266 }
  0xc8   :  { %v156_v29 = vpop.permute.xlu1 %155 }
  0xc9   :  { %v158_v2 = vsel %vm157_vm3, %v154_v25, %v156_v29  ;;  %v159_v3 = vsel %vm157_vm3, %v156_v29, %v154_v25 }
  0xca   :  { %v173_v15 = vmul.f32 %v166_v54, %v159_v3  ;;  %v174_v16 = vmul.f32 %v170_v63, %v158_v2 }
  0xcc   :  { %v184_v34 = vpop.permute.xlu1 %183  ;;  %v297_v36 = vpop.permute.xlu0 %296  ;;  %v179_v38 = vmul.f32 %v534_v27, %v173_v15  ;;  %v180_v39 = vmul.f32 %v534_v27, %v174_v16  ;;  %v290_v27 = vrot.slane %v281_v40, %v540_v31 }
  0xce   :  { %v182_v52 = vadd.f32 %v180_v39, %v152_v46 }
  0xd0   :  { %v186_v44 = vpop.permute.xlu1 %185 }
  0xd1   :  { %v188_v13 = vsel %vm187_vm4, %v184_v34, %v186_v44  ;;  %v189_v18 = vsel %vm187_vm4, %v186_v44, %v184_v34  ;;  %v121_v34 = vadd.f32 %v119_v9, %v91_v19 }
  0xd2   :  { %v203_v29 = vmul.f32 %v196_v7, %v188_v13  ;;  %v204_v33 = vmul.f32 %v200_v11, %v189_v18 }
  0xd3   :  { %v151_v44 = vadd.f32 %v149_v14, %v121_v34 }
  0xd4   :  { %v214_v60 = vpop.permute.xlu1 %213  ;;  %v209_v47 = vmul.f32 %v542_v32, %v203_v29  ;;  %v210_v48 = vmul.f32 %v542_v32, %v204_v33  ;;  %v274_v32 = vpop.permute.xlu0 %273 }
  0xd5   :  { %v181_v51 = vadd.f32 %v179_v38, %v151_v44 }
  0xd7   :  { %v211_v59 = vadd.f32 %v209_v47, %v181_v51 }
  0xd8   :  { %v216_v12 = vpop.permute.xlu1 %215 }
  0xd9   :  { %v218_v24 = vsel %vm217_vm5, %v214_v60, %v216_v12  ;;  %v219_v25 = vsel %vm217_vm5, %v216_v12, %v214_v60  ;;  %v212_v60 = vadd.f32 %v210_v48, %v182_v52 }
  0xda   :  { %v233_v41 = vmul.f32 %v226_v21, %v218_v24  ;;  %v234_v42 = vmul.f32 %v230_v22, %v219_v25 }
  0xdc   :  { %v244_v35 = vpop.permute.xlu1 %243  ;;  %v239_v55 = vmul.f32 %v551_v45, %v233_v41  ;;  %v240_v56 = vmul.f32 %v551_v45, %v234_v42 }
  0xde   :  { %v241_v0 = vadd.f32 %v239_v55, %v211_v59  ;;  %v242_v1 = vadd.f32 %v240_v56, %v212_v60 }
  0xe0   :  { %v246_v49 = vpop.permute.xlu1 %245 }
  0xe1   :  { %v248_v53 = vsel %vm247_vm6, %v244_v35, %v246_v49  ;;  %v249_v54 = vsel %vm247_vm6, %v246_v49, %v244_v35 }
  0xe2   :  { %v263_v57 = vmul.f32 %v256_v17, %v248_v53  ;;  %v264_v58 = vmul.f32 %v260_v43, %v249_v54 }
  0xe4   :  { %v269_v30 = vmul.f32 %v267_v4, %v263_v57  ;;  %v270_v61 = vmul.f32 %v267_v4, %v264_v58  ;;  %v276_v31 = vpop.permute.xlu1 %275 }
  0xe5   :  { %v278_v62 = vsel %vm277_vm7, %v274_v32, %v276_v31  ;;  %v279_v63 = vsel %vm277_vm7, %v276_v31, %v274_v32 }
  0xe6   :  { %v293_v2 = vmul.f32 %v286_v50, %v278_v62  ;;  %v294_v3 = vmul.f32 %v290_v27, %v279_v63  ;;  %v271_v45 = vadd.f32 %v269_v30, %v241_v0  ;;  %v272_v5 = vadd.f32 %v270_v61, %v242_v1 }
  0xe8   :  { %v299_v6 = vmul.f32 %v297_v36, %v293_v2  ;;  %v300_v7 = vmul.f32 %v297_v36, %v294_v3 }
  0xea   :  { %v301_v8 = vadd.f32 %v299_v6, %v271_v45  ;;  %v302_v9 = vadd.f32 %v300_v7, %v272_v5 }
  0xec   :  { %303 = vst [vmem:[#allocation7] sm:$0xff] %v301_v8  ;;  %304 = vst [vmem:[#allocation7 + $0x8] sm:$0xff] %v302_v9 }
  0xed   :  { %407 = shalt.err (!%p404_p6)
}
  0xee   :  { %s408_s29 = scalar_lea.hbm %s614_s4, 256 }
  0xef   :  { %p409_p7 = scmp.ne.s32.totalorder %s614_s4, %s408_s29  ;;  %p412_p8 = scmp.lt.u32.totalorder %s408_s29, %s614_s4 }
  0xf1   :  { %p414_p9 = pnand %p412_p8, %p409_p7 }
  0xf3   :  { %417 = shalt.err (!%p414_p9)
}
  0xf4   :  { %314 = dma.vmem_to_hbm [thread:$0]  %s312_s25, 256, %s614_s4, [#allocation4]  }
  0xf5   :  { %422 = dma.done.wait [#allocation4], 256  }
  0xf6   :  { %423 = vsyncadd [#allocation4], 4294967040 }
  0xf7   :  { %318 = vsyncpa [#allocation3], 1 }
  0xf8   :  { %319 = vsyncpa [#allocation6], 1 }
  0xf9   :  { %320 = vsyncpa [#allocation4], 1 }

</bundles_post_ra>
